<compile_context>
chip_gen: v6e
topology: v6e:2x2x1
jax: 0.10.0
libtpu: 0.0.40
codegen_flags: <defaults>
</compile_context>

<pallas_src>
import functools

import jax
import jax.numpy as jnp
from jax.experimental import pallas as pl
from jax.experimental.pallas import tpu as pltpu

_LANE = 128
_SUBLANE = 8
_MAX_TB = 1024  # batch-tile rows per grid step


def _round_up(n, m):
    return ((n + m - 1) // m) * m


# ----------------------------------------------------------------------------
# Pallas kernels (all tensors already lane-padded to multiples of 128)
# ----------------------------------------------------------------------------
def _encoder_kernel(x_ref, w1, b1, w2, b2, o_ref):
    # encoder: Linear(in->20) -> Tanh -> Linear(20->10) -> Tanh
    h = jnp.tanh(
        jnp.dot(x_ref[...], w1[...], preferred_element_type=jnp.float32) + b1[...]
    )
    h = jnp.tanh(
        jnp.dot(h, w2[...], preferred_element_type=jnp.float32) + b2[...]
    )
    o_ref[...] = h


def _autoencoder_kernel(x_ref, w1, b1, w2, b2, w3, b3, w4, b4, w5, b5, o_ref):
    # encoder
    h = jnp.tanh(
        jnp.dot(x_ref[...], w1[...], preferred_element_type=jnp.float32) + b1[...]
    )
    h = jnp.tanh(
        jnp.dot(h, w2[...], preferred_element_type=jnp.float32) + b2[...]
    )
    # decoder: Linear(10->20) -> Tanh -> Linear(20->in) -> Tanh -> Linear(in->in)
    h = jnp.tanh(
        jnp.dot(h, w3[...], preferred_element_type=jnp.float32) + b3[...]
    )
    h = jnp.tanh(
        jnp.dot(h, w4[...], preferred_element_type=jnp.float32) + b4[...]
    )
    o_ref[...] = (
        jnp.dot(h, w5[...], preferred_element_type=jnp.float32) + b5[...]
    )


# ----------------------------------------------------------------------------
# Parameter init (deterministic, mimics PyTorch Linear default U(-k, k))
# ----------------------------------------------------------------------------
def _init_linear(key, fan_in, fan_out):
    kw, kb = jax.random.split(key)
    bound = 1.0 / jnp.sqrt(jnp.float32(fan_in))
    w = jax.random.uniform(kw, (fan_in, fan_out), jnp.float32, -bound, bound)
    b = jax.random.uniform(kb, (1, fan_out), jnp.float32, -bound, bound)
    return w, b


def init_params(key, input_nodes, training_mode):
    keys = jax.random.split(key, 5)
    params = []
    params += _init_linear(keys[0], input_nodes, 20)              # encoder L1
    params += _init_linear(keys[1], 20, 10)                       # encoder L2
    if training_mode == "train":
        params += _init_linear(keys[2], 10, 20)                   # decoder L1
        params += _init_linear(keys[3], 20, input_nodes)          # decoder L2
        params += _init_linear(keys[4], input_nodes, input_nodes) # decoder L3
    return tuple(params)


# ----------------------------------------------------------------------------
# Wrapper: Sparse_Propensity_net.forward as a single gridded Pallas call
# ----------------------------------------------------------------------------
@functools.partial(jax.jit, static_argnames=("training_mode",))
def sparse_propensity_net_forward(x, params, training_mode="train"):
    x = x.astype(jnp.float32)
    batch, input_nodes = x.shape

    if training_mode == "train":
        dims = (input_nodes, 20, 10, 20, input_nodes, input_nodes)
        kernel = _autoencoder_kernel
    else:
        dims = (input_nodes, 20, 10)
        kernel = _encoder_kernel
    out_dim = dims[-1]
    n_layers = len(dims) - 1

    # Lane-dense padded dims (multiples of 128).
    pdims = tuple(_round_up(d, _LANE) for d in dims)

    # Zero-pad weights/biases once per call (exact: see header comment).
    padded_params = []
    for li in range(n_layers):
        w = params[2 * li].astype(jnp.float32)
        b = params[2 * li + 1].astype(jnp.float32).reshape(1, -1)
        w = jnp.pad(w, ((0, pdims[li] - dims[li]), (0, pdims[li + 1] - dims[li + 1])))
        b = jnp.pad(b, ((0, 0), (0, pdims[li + 1] - dims[li + 1])))
        padded_params += [w, b]

    # Batch tile: big enough to feed the MXU M dim, tiny in VMEM (<2 MiB total).
    tb = min(_MAX_TB, _round_up(batch, _SUBLANE))
    batch_p = _round_up(batch, tb)
    x_p = jnp.pad(x, ((0, batch_p - batch), (0, pdims[0] - input_nodes)))

    grid = (batch_p // tb,)
    x_spec = pl.BlockSpec((tb, pdims[0]), lambda i: (i, 0))
    out_spec = pl.BlockSpec((tb, pdims[-1]), lambda i: (i, 0))
    # Weights/biases: full-array blocks, constant index_map -> VMEM residents.
    param_specs = []
    for li in range(n_layers):
        param_specs.append(
            pl.BlockSpec((pdims[li], pdims[li + 1]), lambda i: (0, 0))
        )
        param_specs.append(pl.BlockSpec((1, pdims[li + 1]), lambda i: (0, 0)))

    # Advisory cost estimate for the XLA scheduler.
    flops = 2 * batch * sum(dims[i] * dims[i + 1] for i in range(n_layers))
    tanh_elems = sum(dims[1:-1]) if training_mode == "train" else sum(dims[1:])
    param_bytes = sum(int(p.size) for p in padded_params) * 4
    cost = pl.CostEstimate(
        flops=int(flops),
        transcendentals=int(batch * tanh_elems),
        bytes_accessed=int(4 * batch_p * (pdims[0] + pdims[-1]) + param_bytes),
    )

    out_p = pl.pallas_call(
        kernel,
        out_shape=jax.ShapeDtypeStruct((batch_p, pdims[-1]), jnp.float32),
        grid=grid,
        in_specs=[x_spec] + param_specs,
        out_specs=out_spec,
        compiler_params=pltpu.CompilerParams(
            dimension_semantics=("parallel",),
        ),
        cost_estimate=cost,
    )(x_p, *padded_params)

    return out_p[:batch, :out_dim]


# Pure-JAX reference for correctness check
def _reference_forward(x, params, training_mode="train"):
    x = x.astype(jnp.float32)
    w1, b1, w2, b2 = params[:4]
    h = jnp.tanh(x @ w1 + b1)
    h = jnp.tanh(h @ w2 + b2)
    if training_mode == "train":
        w3, b3, w4, b4, w5, b5 = params[4:]
        h = jnp.tanh(h @ w3 + b3)
        h = jnp.tanh(h @ w4 + b4)
        h = h @ w5 + b5
    return h


if __name__ == "__main__":
    training_mode = "train"
    batch, input_nodes = 8, 25  # Jobs-style feature count (small)

    key = jax.random.PRNGKey(0)
    k_params, k_x = jax.random.split(key)
    params = init_params(k_params, input_nodes, training_mode)
    x = jax.random.normal(k_x, (batch, input_nodes), jnp.float32)

    out = sparse_propensity_net_forward(x, params, training_mode=training_mode)
    out = jax.block_until_ready(out)
    ref = _reference_forward(x, params, training_mode=training_mode)
    assert out.shape == (batch, input_nodes)
    assert jnp.allclose(out, ref, atol=1e-4, rtol=1e-4), "mismatch vs reference (train)"

    # Also exercise the eval (encoder-only) path.
    out_eval = jax.block_until_ready(
        sparse_propensity_net_forward(x, params[:4], training_mode="eval")
    )
    ref_eval = _reference_forward(x, params[:4], training_mode="eval")
    assert out_eval.shape == (batch, 10)
    assert jnp.allclose(out_eval, ref_eval, atol=1e-4, rtol=1e-4), "mismatch vs reference (eval)"

    # Larger batch exercises the multi-tile grid / pipelined path.
    big_batch = 3000
    xb = jax.random.normal(jax.random.PRNGKey(1), (big_batch, input_nodes), jnp.float32)
    out_big = jax.block_until_ready(
        sparse_propensity_net_forward(xb, params, training_mode="train")
    )
    ref_big = _reference_forward(xb, params, training_mode="train")
    assert out_big.shape == (big_batch, input_nodes)
    assert jnp.allclose(out_big, ref_big, atol=1e-4, rtol=1e-4), "mismatch vs reference (big batch)"

    print("KERNEL_OK")
</pallas_src>

<mosaic_0001>
module attributes {stable_mosaic.version = 11 : i64} {
  func.func @_autoencoder_kernel(%arg0: i32, %arg1: memref<8x128xf32, #tpu.memory_space<vmem>>, %arg2: memref<128x128xf32, #tpu.memory_space<vmem>>, %arg3: memref<1x128xf32, #tpu.memory_space<vmem>>, %arg4: memref<128x128xf32, #tpu.memory_space<vmem>>, %arg5: memref<1x128xf32, #tpu.memory_space<vmem>>, %arg6: memref<128x128xf32, #tpu.memory_space<vmem>>, %arg7: memref<1x128xf32, #tpu.memory_space<vmem>>, %arg8: memref<128x128xf32, #tpu.memory_space<vmem>>, %arg9: memref<1x128xf32, #tpu.memory_space<vmem>>, %arg10: memref<128x128xf32, #tpu.memory_space<vmem>>, %arg11: memref<1x128xf32, #tpu.memory_space<vmem>>, %arg12: memref<8x128xf32, #tpu.memory_space<vmem>>) attributes {dimension_semantics = [#tpu.dimension_semantics<parallel>], iteration_bounds = array<i64: 1>, scalar_prefetch = 0 : i64, scratch_operands = 0 : i64, tpu.core_type = #tpu.core_type<tc>, window_params = [{transform_indices = @transform_0, window_bounds = array<i64: 8, 128>}, {pipeline_mode = #tpu.pipeline_mode<synchronous>, transform_indices = @transform_1, window_bounds = array<i64: 128, 128>}, {pipeline_mode = #tpu.pipeline_mode<synchronous>, transform_indices = @transform_2, window_bounds = array<i64: 1, 128>}, {pipeline_mode = #tpu.pipeline_mode<synchronous>, transform_indices = @transform_3, window_bounds = array<i64: 128, 128>}, {pipeline_mode = #tpu.pipeline_mode<synchronous>, transform_indices = @transform_4, window_bounds = array<i64: 1, 128>}, {pipeline_mode = #tpu.pipeline_mode<synchronous>, transform_indices = @transform_5, window_bounds = array<i64: 128, 128>}, {pipeline_mode = #tpu.pipeline_mode<synchronous>, transform_indices = @transform_6, window_bounds = array<i64: 1, 128>}, {pipeline_mode = #tpu.pipeline_mode<synchronous>, transform_indices = @transform_7, window_bounds = array<i64: 128, 128>}, {pipeline_mode = #tpu.pipeline_mode<synchronous>, transform_indices = @transform_8, window_bounds = array<i64: 1, 128>}, {pipeline_mode = #tpu.pipeline_mode<synchronous>, transform_indices = @transform_9, window_bounds = array<i64: 128, 128>}, {pipeline_mode = #tpu.pipeline_mode<synchronous>, transform_indices = @transform_10, window_bounds = array<i64: 1, 128>}, {transform_indices = @transform_11, window_bounds = array<i64: 8, 128>}]} {
    %c0 = arith.constant 0 : index
    %c0_0 = arith.constant 0 : index
    %0 = vector.load %arg1[%c0, %c0_0] : memref<8x128xf32, #tpu.memory_space<vmem>>, vector<8x128xf32>
    %c0_1 = arith.constant 0 : index
    %c0_2 = arith.constant 0 : index
    %1 = vector.load %arg2[%c0_1, %c0_2] : memref<128x128xf32, #tpu.memory_space<vmem>>, vector<128x128xf32>
    %cst = arith.constant dense<0.000000e+00> : vector<8x128xf32>
    %2 = tpu.matmul %0, %1, %cst {dimension_numbers = #tpu.dot_dimension_numbers<[1], [0], [0], [1], [0, 0, 1, 1], [], []>} : vector<8x128xf32>, vector<128x128xf32>, vector<8x128xf32> -> vector<8x128xf32>
    %c0_3 = arith.constant 0 : index
    %c0_4 = arith.constant 0 : index
    %3 = vector.load %arg3[%c0_3, %c0_4] : memref<1x128xf32, #tpu.memory_space<vmem>>, vector<1x128xf32>
    %4 = vector.broadcast %3 : vector<1x128xf32> to vector<8x128xf32>
    %5 = arith.addf %2, %4 : vector<8x128xf32>
    %6 = math.tanh %5 : vector<8x128xf32>
    %c0_5 = arith.constant 0 : index
    %c0_6 = arith.constant 0 : index
    %7 = vector.load %arg4[%c0_5, %c0_6] : memref<128x128xf32, #tpu.memory_space<vmem>>, vector<128x128xf32>
    %cst_7 = arith.constant dense<0.000000e+00> : vector<8x128xf32>
    %8 = tpu.matmul %6, %7, %cst_7 {dimension_numbers = #tpu.dot_dimension_numbers<[1], [0], [0], [1], [0, 0, 1, 1], [], []>} : vector<8x128xf32>, vector<128x128xf32>, vector<8x128xf32> -> vector<8x128xf32>
    %c0_8 = arith.constant 0 : index
    %c0_9 = arith.constant 0 : index
    %9 = vector.load %arg5[%c0_8, %c0_9] : memref<1x128xf32, #tpu.memory_space<vmem>>, vector<1x128xf32>
    %10 = vector.broadcast %9 : vector<1x128xf32> to vector<8x128xf32>
    %11 = arith.addf %8, %10 : vector<8x128xf32>
    %12 = math.tanh %11 : vector<8x128xf32>
    %c0_10 = arith.constant 0 : index
    %c0_11 = arith.constant 0 : index
    %13 = vector.load %arg6[%c0_10, %c0_11] : memref<128x128xf32, #tpu.memory_space<vmem>>, vector<128x128xf32>
    %cst_12 = arith.constant dense<0.000000e+00> : vector<8x128xf32>
    %14 = tpu.matmul %12, %13, %cst_12 {dimension_numbers = #tpu.dot_dimension_numbers<[1], [0], [0], [1], [0, 0, 1, 1], [], []>} : vector<8x128xf32>, vector<128x128xf32>, vector<8x128xf32> -> vector<8x128xf32>
    %c0_13 = arith.constant 0 : index
    %c0_14 = arith.constant 0 : index
    %15 = vector.load %arg7[%c0_13, %c0_14] : memref<1x128xf32, #tpu.memory_space<vmem>>, vector<1x128xf32>
    %16 = vector.broadcast %15 : vector<1x128xf32> to vector<8x128xf32>
    %17 = arith.addf %14, %16 : vector<8x128xf32>
    %18 = math.tanh %17 : vector<8x128xf32>
    %c0_15 = arith.constant 0 : index
    %c0_16 = arith.constant 0 : index
    %19 = vector.load %arg8[%c0_15, %c0_16] : memref<128x128xf32, #tpu.memory_space<vmem>>, vector<128x128xf32>
    %cst_17 = arith.constant dense<0.000000e+00> : vector<8x128xf32>
    %20 = tpu.matmul %18, %19, %cst_17 {dimension_numbers = #tpu.dot_dimension_numbers<[1], [0], [0], [1], [0, 0, 1, 1], [], []>} : vector<8x128xf32>, vector<128x128xf32>, vector<8x128xf32> -> vector<8x128xf32>
    %c0_18 = arith.constant 0 : index
    %c0_19 = arith.constant 0 : index
    %21 = vector.load %arg9[%c0_18, %c0_19] : memref<1x128xf32, #tpu.memory_space<vmem>>, vector<1x128xf32>
    %22 = vector.broadcast %21 : vector<1x128xf32> to vector<8x128xf32>
    %23 = arith.addf %20, %22 : vector<8x128xf32>
    %24 = math.tanh %23 : vector<8x128xf32>
    %c0_20 = arith.constant 0 : index
    %c0_21 = arith.constant 0 : index
    %25 = vector.load %arg10[%c0_20, %c0_21] : memref<128x128xf32, #tpu.memory_space<vmem>>, vector<128x128xf32>
    %cst_22 = arith.constant dense<0.000000e+00> : vector<8x128xf32>
    %26 = tpu.matmul %24, %25, %cst_22 {dimension_numbers = #tpu.dot_dimension_numbers<[1], [0], [0], [1], [0, 0, 1, 1], [], []>} : vector<8x128xf32>, vector<128x128xf32>, vector<8x128xf32> -> vector<8x128xf32>
    %c0_23 = arith.constant 0 : index
    %c0_24 = arith.constant 0 : index
    %27 = vector.load %arg11[%c0_23, %c0_24] : memref<1x128xf32, #tpu.memory_space<vmem>>, vector<1x128xf32>
    %28 = vector.broadcast %27 : vector<1x128xf32> to vector<8x128xf32>
    %29 = arith.addf %26, %28 : vector<8x128xf32>
    %c0_25 = arith.constant 0 : index
    %c0_26 = arith.constant 0 : index
    %30 = vector.load %arg12[%c0_25, %c0_26] : memref<8x128xf32, #tpu.memory_space<vmem>>, vector<8x128xf32>
    tpu.vector_store %arg12[%c0_25, %c0_26], %29 {strides = array<i32>} : memref<8x128xf32, #tpu.memory_space<vmem>>, vector<8x128xf32>,
    return
  }
  func.func @transform_0(%arg0: i32) -> (i32, i32) {
    %c0_i32 = arith.constant 0 : i32
    %c0_i32_0 = arith.constant 0 : i32
    return %arg0, %c0_i32 : i32, i32
  }
  func.func @transform_1(%arg0: i32) -> (i32, i32) {
    %c0_i32 = arith.constant 0 : i32
    %c0_i32_0 = arith.constant 0 : i32
    %c0_i32_1 = arith.constant 0 : i32
    return %c0_i32, %c0_i32_0 : i32, i32
  }
  func.func @transform_2(%arg0: i32) -> (i32, i32) {
    %c0_i32 = arith.constant 0 : i32
    %c0_i32_0 = arith.constant 0 : i32
    %c0_i32_1 = arith.constant 0 : i32
    return %c0_i32, %c0_i32_0 : i32, i32
  }
  func.func @transform_3(%arg0: i32) -> (i32, i32) {
    %c0_i32 = arith.constant 0 : i32
    %c0_i32_0 = arith.constant 0 : i32
    %c0_i32_1 = arith.constant 0 : i32
    return %c0_i32, %c0_i32_0 : i32, i32
  }
  func.func @transform_4(%arg0: i32) -> (i32, i32) {
    %c0_i32 = arith.constant 0 : i32
    %c0_i32_0 = arith.constant 0 : i32
    %c0_i32_1 = arith.constant 0 : i32
    return %c0_i32, %c0_i32_0 : i32, i32
  }
  func.func @transform_5(%arg0: i32) -> (i32, i32) {
    %c0_i32 = arith.constant 0 : i32
    %c0_i32_0 = arith.constant 0 : i32
    %c0_i32_1 = arith.constant 0 : i32
    return %c0_i32, %c0_i32_0 : i32, i32
  }
  func.func @transform_6(%arg0: i32) -> (i32, i32) {
    %c0_i32 = arith.constant 0 : i32
    %c0_i32_0 = arith.constant 0 : i32
    %c0_i32_1 = arith.constant 0 : i32
    return %c0_i32, %c0_i32_0 : i32, i32
  }
  func.func @transform_7(%arg0: i32) -> (i32, i32) {
    %c0_i32 = arith.constant 0 : i32
    %c0_i32_0 = arith.constant 0 : i32
    %c0_i32_1 = arith.constant 0 : i32
    return %c0_i32, %c0_i32_0 : i32, i32
  }
  func.func @transform_8(%arg0: i32) -> (i32, i32) {
    %c0_i32 = arith.constant 0 : i32
    %c0_i32_0 = arith.constant 0 : i32
    %c0_i32_1 = arith.constant 0 : i32
    return %c0_i32, %c0_i32_0 : i32, i32
  }
  func.func @transform_9(%arg0: i32) -> (i32, i32) {
    %c0_i32 = arith.constant 0 : i32
    %c0_i32_0 = arith.constant 0 : i32
    %c0_i32_1 = arith.constant 0 : i32
    return %c0_i32, %c0_i32_0 : i32, i32
  }
  func.func @transform_10(%arg0: i32) -> (i32, i32) {
    %c0_i32 = arith.constant 0 : i32
    %c0_i32_0 = arith.constant 0 : i32
    %c0_i32_1 = arith.constant 0 : i32
    return %c0_i32, %c0_i32_0 : i32, i32
  }
  func.func @transform_11(%arg0: i32) -> (i32, i32) {
    %c0_i32 = arith.constant 0 : i32
    %c0_i32_0 = arith.constant 0 : i32
    return %arg0, %c0_i32 : i32, i32
  }
}

</mosaic_0001>

<bundles_post_ra>
// kernel: sparse_propensity_net_forward.1
= control target key start
LH: loop header
LB: loop body
LE: loop exit
PB: predicated region body
PF: predicated region fallthrough
CT: control target
= control target key end

     0   :  { %v822_v1 = vmov 0.0   ;;  %vm823_vm0 = vmmov 0   ;;  %s1236_s0 = inlined_call_operand.vmem [shape: f32[8,128], index: 0, kind: input, shape index: {}]   ;;  %s1237_s1 = inlined_call_operand.vmem [shape: f32[128,128], index: 1, kind: input, shape index: {}]   ;;  %s1238_s2 = inlined_call_operand.vmem [shape: f32[1,128], index: 2, kind: input, shape index: {}]   ;;  %s1239_s3 = inlined_call_operand.vmem [shape: f32[128,128], index: 3, kind: input, shape index: {}]   ;;  %s1240_s4 = inlined_call_operand.vmem [shape: f32[1,128], index: 4, kind: input, shape index: {}]   ;;  %s1241_s5 = inlined_call_operand.vmem [shape: f32[128,128], index: 5, kind: input, shape index: {}]   ;;  %s1242_s6 = inlined_call_operand.vmem [shape: f32[1,128], index: 6, kind: input, shape index: {}]   ;;  %s1243_s7 = inlined_call_operand.vmem [shape: f32[128,128], index: 7, kind: input, shape index: {}]   ;;  %s1244_s8 = inlined_call_operand.vmem [shape: f32[1,128], index: 8, kind: input, shape index: {}]   ;;  %s1245_s9 = inlined_call_operand.vmem [shape: f32[128,128], index: 9, kind: input, shape index: {}]   ;;  %s1246_s10 = inlined_call_operand.vmem [shape: f32[1,128], index: 10, kind: input, shape index: {}]   ;;  %s1247_s11 = inlined_call_operand.hbm [shape: f32[8,128], index: 11, kind: output, shape index: {}]  }
   0x1   :  { %v55_v0 = vld [vmem:[%s1237_s1 + $0x78] sm:$0xff]  ;;  %614 = vmatprep.subr.mxu0 %v822_v1  ;;  %v54_v2 = vld [vmem:[%s1237_s1 + $0x70] sm:$0xff]  ;;  %646 = vmatprep.mubr.msk.f32.mxu0 %vm823_vm0, %v822_v1  ;;  %v53_v3 = vld [vmem:[%s1237_s1 + $0x68] sm:$0xff] }
   0x2   :  { %615 = vmatpush3.msra.mxu0 %v55_v0  ;;  %649 = vmatprep.subr.mxu1 %v822_v1  ;;  %v52_v4 = vld [vmem:[%s1237_s1 + $0x60] sm:$0xff]  ;;  %v149_v5 = vld [vmem:[%s1239_s3 + $0x78] sm:$0xff]  ;;  %v148_v6 = vld [vmem:[%s1239_s3 + $0x70] sm:$0xff] }
   0x3   :  { %616 = vmatprep.subr.mxu0 %v822_v1  ;;  %681 = vmatprep.mubr.msk.f32.mxu1 %vm823_vm0, %v822_v1  ;;  %v51_v7 = vld [vmem:[%s1237_s1 + $0x58] sm:$0xff]  ;;  %v147_v8 = vld [vmem:[%s1239_s3 + $0x68] sm:$0xff] }
   0x4   :  { %617 = vmatpush3.msra.mxu0 %v54_v2  ;;  %650 = vmatpush3.msra.mxu1 %v149_v5 }
   0x5   :  { %618 = vmatprep.subr.mxu0 %v822_v1  ;;  %651 = vmatprep.subr.mxu1 %v822_v1 }
   0x6   :  { %619 = vmatpush3.msra.mxu0 %v53_v3  ;;  %652 = vmatpush3.msra.mxu1 %v148_v6 }
   0x7   :  { %620 = vmatprep.subr.mxu0 %v822_v1 }
   0x8   :  { %621 = vmatpush3.msra.mxu0 %v52_v4 }
   0x9   :  { %16 = vsyncpa [#allocation3], 0  ;;  %622 = vmatprep.subr.mxu0 %v822_v1  ;;  %v50_v9 = vld [vmem:[%s1237_s1 + $0x50] sm:$0xff]  ;;  %653 = vmatprep.subr.mxu1 %v822_v1  ;;  %v146_v10 = vld [vmem:[%s1239_s3 + $0x60] sm:$0xff] }
   0xa   :  { %623 = vmatpush3.msra.mxu0 %v51_v7  ;;  %654 = vmatpush3.msra.mxu1 %v147_v8  ;;  %v49_v11 = vld [vmem:[%s1237_s1 + $0x48] sm:$0xff]  ;;  %v145_v12 = vld [vmem:[%s1239_s3 + $0x58] sm:$0xff]  ;;  %v48_v13 = vld [vmem:[%s1237_s1 + $0x40] sm:$0xff] }
   0xb   :  { %624 = vmatprep.subr.mxu0 %v822_v1  ;;  %655 = vmatprep.subr.mxu1 %v822_v1  ;;  %v144_v14 = vld [vmem:[%s1239_s3 + $0x50] sm:$0xff]  ;;  %v47_v15 = vld [vmem:[%s1237_s1 + $0x38] sm:$0xff]  ;;  %v143_v16 = vld [vmem:[%s1239_s3 + $0x48] sm:$0xff] }
   0xc   :  { %625 = vmatpush3.msra.mxu0 %v50_v9  ;;  %656 = vmatpush3.msra.mxu1 %v146_v10  ;;  %v46_v17 = vld [vmem:[%s1237_s1 + $0x30] sm:$0xff]  ;;  %v45_v18 = vld [vmem:[%s1237_s1 + $0x28] sm:$0xff]  ;;  %v44_v19 = vld [vmem:[%s1237_s1 + $0x20] sm:$0xff] }
   0xd   :  { %626 = vmatprep.subr.mxu0 %v822_v1  ;;  %657 = vmatprep.subr.mxu1 %v822_v1  ;;  %v43_v20 = vld [vmem:[%s1237_s1 + $0x18] sm:$0xff]  ;;  %v42_v21 = vld [vmem:[%s1237_s1 + $0x10] sm:$0xff]  ;;  %v41_v22 = vld [vmem:[%s1237_s1 + $0x8] sm:$0xff] }
   0xe   :  { %627 = vmatpush3.msra.mxu0 %v49_v11  ;;  %658 = vmatpush3.msra.mxu1 %v145_v12  ;;  %v40_v23 = vld [vmem:[%s1237_s1] sm:$0xff]  ;;  %v141_v26 = vld [vmem:[%s1239_s3 + $0x38] sm:$0xff]  ;;  %v140_v27 = vld [vmem:[%s1239_s3 + $0x30] sm:$0xff] }
   0xf   :  { %628 = vmatprep.subr.mxu0 %v822_v1  ;;  %659 = vmatprep.subr.mxu1 %v822_v1  ;;  %v39_v24 = vld [vmem:[%s1236_s0] sm:$0xff]  ;;  %v139_v28 = vld [vmem:[%s1239_s3 + $0x28] sm:$0xff]  ;;  %v137_v30 = vld [vmem:[%s1239_s3 + $0x18] sm:$0xff] }
  0x10   :  { %629 = vmatpush3.msra.mxu0 %v48_v13  ;;  %660 = vmatpush3.msra.mxu1 %v144_v14  ;;  %v142_v25 = vld [vmem:[%s1239_s3 + $0x40] sm:$0xff]  ;;  %v136_v31 = vld [vmem:[%s1239_s3 + $0x10] sm:$0xff]  ;;  %v135_v32 = vld [vmem:[%s1239_s3 + $0x8] sm:$0xff] }
  0x11   :  { %630 = vmatprep.subr.mxu0 %v822_v1  ;;  %661 = vmatprep.subr.mxu1 %v822_v1  ;;  %v138_v29 = vld [vmem:[%s1239_s3 + $0x20] sm:$0xff]  ;;  %v243_v34 = vld [vmem:[%s1241_s5 + $0x78] sm:$0xff]  ;;  %v242_v35 = vld [vmem:[%s1241_s5 + $0x70] sm:$0xff] }
  0x12   :  { %631 = vmatpush3.msra.mxu0 %v47_v15  ;;  %662 = vmatpush3.msra.mxu1 %v143_v16  ;;  %v134_v33 = vld [vmem:[%s1239_s3] sm:$0xff]  ;;  %v241_v36 = vld [vmem:[%s1241_s5 + $0x68] sm:$0xff]  ;;  %v239_v38 = vld [vmem:[%s1241_s5 + $0x58] sm:$0xff]  ;;  %s824_s3 = smov [#allocation2]  }
  0x13   :  { %632 = vmatprep.subr.mxu0 %v822_v1  ;;  %663 = vmatprep.subr.mxu1 %v822_v1  ;;  %v240_v37 = vld [vmem:[%s1241_s5 + $0x60] sm:$0xff]  ;;  %v238_v39 = vld [vmem:[%s1241_s5 + $0x50] sm:$0xff]  ;;  %v237_v40 = vld [vmem:[%s1241_s5 + $0x48] sm:$0xff] }
  0x14   :  { %633 = vmatpush3.msra.mxu0 %v46_v17  ;;  %664 = vmatpush3.msra.mxu1 %v142_v25  ;;  %v524_v41 = vld [vmem:[%s1238_s2] ss:$0 sm:$0xff]  ;;  %v235_v47 = vld [vmem:[%s1241_s5 + $0x38] sm:$0xff]  ;;  %v234_v48 = vld [vmem:[%s1241_s5 + $0x30] sm:$0xff] }
  0x15   :  { %634 = vmatprep.subr.mxu0 %v822_v1  ;;  %665 = vmatprep.subr.mxu1 %v822_v1  ;;  %v236_v46 = vld [vmem:[%s1241_s5 + $0x40] sm:$0xff]  ;;  %v233_v49 = vld [vmem:[%s1241_s5 + $0x28] sm:$0xff]  ;;  %v231_v51 = vld [vmem:[%s1241_s5 + $0x18] sm:$0xff] }
  0x16   :  { %635 = vmatpush3.msra.mxu0 %v45_v18  ;;  %666 = vmatpush3.msra.mxu1 %v141_v26  ;;  %v232_v50 = vld [vmem:[%s1241_s5 + $0x20] sm:$0xff]  ;;  %v230_v52 = vld [vmem:[%s1241_s5 + $0x10] sm:$0xff]  ;;  %v229_v53 = vld [vmem:[%s1241_s5 + $0x8] sm:$0xff] }
  0x17   :  { %636 = vmatprep.subr.mxu0 %v822_v1  ;;  %667 = vmatprep.subr.mxu1 %v822_v1  ;;  %v228_v54 = vld [vmem:[%s1241_s5] sm:$0xff]  ;;  %v337_v55 = vld [vmem:[%s1243_s7 + $0x78] sm:$0xff]  ;;  %v336_v56 = vld [vmem:[%s1243_s7 + $0x70] sm:$0xff] }
  0x18   :  { %637 = vmatpush3.msra.mxu0 %v44_v19  ;;  %668 = vmatpush3.msra.mxu1 %v140_v27  ;;  %v335_v57 = vld [vmem:[%s1243_s7 + $0x68] sm:$0xff]  ;;  %v334_v58 = vld [vmem:[%s1243_s7 + $0x60] sm:$0xff]  ;;  %v333_v59 = vld [vmem:[%s1243_s7 + $0x58] sm:$0xff] }
  0x19   :  { %638 = vmatprep.subr.mxu0 %v822_v1  ;;  %669 = vmatprep.subr.mxu1 %v822_v1  ;;  %v332_v60 = vld [vmem:[%s1243_s7 + $0x50] sm:$0xff]  ;;  %v331_v61 = vld [vmem:[%s1243_s7 + $0x48] sm:$0xff]  ;;  %v525_v62 = vld [vmem:[%s1240_s4] ss:$0 sm:$0xff] }
  0x1a   :  { %639 = vmatpush3.msra.mxu0 %v43_v20  ;;  %670 = vmatpush3.msra.mxu1 %v139_v28  ;;  %v330_v4 = vld [vmem:[%s1243_s7 + $0x40] sm:$0xff]  ;;  %v329_v5 = vld [vmem:[%s1243_s7 + $0x38] sm:$0xff]  ;;  %v328_v6 = vld [vmem:[%s1243_s7 + $0x30] sm:$0xff] }
  0x1b   :  { %640 = vmatprep.subr.mxu0 %v822_v1  ;;  %671 = vmatprep.subr.mxu1 %v822_v1  ;;  %v327_v7 = vld [vmem:[%s1243_s7 + $0x28] sm:$0xff]  ;;  %v326_v8 = vld [vmem:[%s1243_s7 + $0x20] sm:$0xff]  ;;  %v325_v9 = vld [vmem:[%s1243_s7 + $0x18] sm:$0xff] }
  0x1c   :  { %641 = vmatpush3.msra.mxu0 %v42_v21  ;;  %672 = vmatpush3.msra.mxu1 %v138_v29  ;;  %v324_v10 = vld [vmem:[%s1243_s7 + $0x10] sm:$0xff]  ;;  %v323_v11 = vld [vmem:[%s1243_s7 + $0x8] sm:$0xff]  ;;  %v322_v12 = vld [vmem:[%s1243_s7] sm:$0xff] }
  0x1d   :  { %642 = vmatprep.subr.mxu0 %v822_v1  ;;  %673 = vmatprep.subr.mxu1 %v822_v1  ;;  %v431_v13 = vld [vmem:[%s1245_s9 + $0x78] sm:$0xff]  ;;  %v430_v14 = vld [vmem:[%s1245_s9 + $0x70] sm:$0xff]  ;;  %v429_v15 = vld [vmem:[%s1245_s9 + $0x68] sm:$0xff] }
  0x1e   :  { %643 = vmatpush3.msra.mxu0 %v41_v22  ;;  %674 = vmatpush3.msra.mxu1 %v137_v30  ;;  %v428_v16 = vld [vmem:[%s1245_s9 + $0x60] sm:$0xff]  ;;  %v427_v17 = vld [vmem:[%s1245_s9 + $0x58] sm:$0xff]  ;;  %v426_v18 = vld [vmem:[%s1245_s9 + $0x50] sm:$0xff] }
  0x1f   :  { %644 = vmatprep.subr.mxu0 %v822_v1  ;;  %675 = vmatprep.subr.mxu1 %v822_v1  ;;  %v425_v19 = vld [vmem:[%s1245_s9 + $0x48] sm:$0xff]  ;;  %v526_v20 = vld [vmem:[%s1242_s6] ss:$0 sm:$0xff]  ;;  %v423_v26 = vld [vmem:[%s1245_s9 + $0x38] sm:$0xff] }
  0x20   :  { %645 = vmatpush3.msra.mxu0 %v40_v23  ;;  %676 = vmatpush3.msra.mxu1 %v136_v31  ;;  %v424_v25 = vld [vmem:[%s1245_s9 + $0x40] sm:$0xff]  ;;  %v422_v27 = vld [vmem:[%s1245_s9 + $0x30] sm:$0xff]  ;;  %v421_v28 = vld [vmem:[%s1245_s9 + $0x28] sm:$0xff] }
  0x21   :  { %647 = vmatmul.mubr.f32.vlgmr.msra.gmra.mxu0 %v39_v24  ;;  %684 = vmatprep.subr.mxu0 %v822_v1  ;;  %v420_v29 = vld [vmem:[%s1245_s9 + $0x20] sm:$0xff]  ;;  %v419_v30 = vld [vmem:[%s1245_s9 + $0x18] sm:$0xff]  ;;  %v418_v31 = vld [vmem:[%s1245_s9 + $0x10] sm:$0xff] }
  0x22   :  { %716 = vmatprep.mubr.msk.f32.mxu0 %vm823_vm0, %v822_v1  ;;  %677 = vmatprep.subr.mxu1 %v822_v1 }
  0x23   :  { %678 = vmatpush3.msra.mxu1 %v135_v32  ;;  %685 = vmatpush3.msra.mxu0 %v243_v34  ;;  %v417_v32 = vld [vmem:[%s1245_s9 + $0x8] sm:$0xff]  ;;  %v527_v34 = vld [vmem:[%s1244_s8] ss:$0 sm:$0xff] }
  0x24   :  { %679 = vmatprep.subr.mxu1 %v822_v1  ;;  %686 = vmatprep.subr.mxu0 %v822_v1 }
  0x25   :  { %680 = vmatpush3.msra.mxu1 %v134_v33  ;;  %687 = vmatpush3.msra.mxu0 %v242_v35  ;;  %v416_v33 = vld [vmem:[%s1245_s9] sm:$0xff]  ;;  %s516_s9 = sshll.u32 %s824_s3, 4  ;;  %s517_s9 = int_to_ptr.vmem [resolvable:$true] %s516_s9 }
  0x26   :  { %719 = vmatprep.subr.mxu1 %v822_v1  ;;  %688 = vmatprep.subr.mxu0 %v822_v1  ;;  %s800_s4 = scalar_lea.vmem %s517_s9, 128  ;;  %p805_p1 = scmp.lt.s32.totalorder %s517_s9, %s517_s9 }
  0x27   :  { %689 = vmatpush3.msra.mxu0 %v241_v36  ;;  %p801_p0 = scmp.ne.s32.totalorder %s517_s9, %s800_s4  ;;  %p806_p2 = scmp.lt.s32.totalorder %s800_s4, %s800_s4 }
  0x28   :  { %690 = vmatprep.subr.mxu0 %v822_v1 }
  0x29   :  { %691 = vmatpush3.msra.mxu0 %v240_v37  ;;  %p807_p3 = por %p806_p2, %p805_p1 }
  0x2a   :  { %692 = vmatprep.subr.mxu0 %v822_v1 }
  0x2b   :  { %693 = vmatpush3.msra.mxu0 %v239_v38  ;;  %p808_p4 = pnand %p807_p3, %p801_p0 }
  0x2c   :  { %694 = vmatprep.subr.mxu0 %v822_v1 }
  0x2d   :  { %695 = vmatpush3.msra.mxu0 %v238_v39  ;;  %v528_v39 = vld [vmem:[%s1246_s10] ss:$0 sm:$0xff] }
  0x2e   :  { %696 = vmatprep.subr.mxu0 %v822_v1 }
  0x2f   :  { %697 = vmatpush3.msra.mxu0 %v237_v40 }
  0x30   :  { %698 = vmatprep.subr.mxu0 %v822_v1 }
  0x31   :  { %699 = vmatpush3.msra.mxu0 %v236_v46 }
  0x32   :  { %700 = vmatprep.subr.mxu0 %v822_v1 }
  0x33   :  { %701 = vmatpush3.msra.mxu0 %v235_v47 }
  0x34   :  { %702 = vmatprep.subr.mxu0 %v822_v1 }
  0x35   :  { %703 = vmatpush3.msra.mxu0 %v234_v48 }
  0x36   :  { %704 = vmatprep.subr.mxu0 %v822_v1 }
  0x37   :  { %705 = vmatpush3.msra.mxu0 %v233_v49 }
  0x38   :  { %706 = vmatprep.subr.mxu0 %v822_v1 }
  0x39   :  { %707 = vmatpush3.msra.mxu0 %v232_v50 }
  0x3a   :  { %708 = vmatprep.subr.mxu0 %v822_v1 }
  0x3b   :  { %709 = vmatpush3.msra.mxu0 %v231_v51 }
  0x3c   :  { %710 = vmatprep.subr.mxu0 %v822_v1 }
  0x3d   :  { %711 = vmatpush3.msra.mxu0 %v230_v52 }
  0x3e   :  { %712 = vmatprep.subr.mxu0 %v822_v1 }
  0x3f   :  { %713 = vmatpush3.msra.mxu0 %v229_v53 }
  0x40   :  { %714 = vmatprep.subr.mxu0 %v822_v1 }
  0x41   :  { %715 = vmatpush3.msra.mxu0 %v228_v54 }
  0x42   :  { %754 = vmatprep.subr.mxu0 %v822_v1 }
  0xe1   :  { %v129_v42 = vpop.f32.mrf.mxu0 }
  0xe2   :  { %v130_v43 = vadd.f32 %v524_v41, %v129_v42 }
  0xe3   :  { %v648_v44 = vpop.f32.mrf.mxu0 }
  0xe4   :  { %792 = vtanh.f32 %v130_v43 }
  0xf1   :  { %v793_v45 = vpop.eup %792 }
  0xf2   :  { %682 = vmatmul.mubr.f32.vlgmr.msra.gmra.mxu1 %v793_v45 }
  0xf3   :  { %751 = vmatprep.mubr.msk.f32.mxu1 %vm823_vm0, %v822_v1  ;;  %720 = vmatpush3.msra.mxu1 %v337_v55 }
  0xf4   :  { %721 = vmatprep.subr.mxu1 %v822_v1 }
  0xf5   :  { %722 = vmatpush3.msra.mxu1 %v336_v56 }
  0xf6   :  { %723 = vmatprep.subr.mxu1 %v822_v1 }
  0xf7   :  { %724 = vmatpush3.msra.mxu1 %v335_v57 }
  0xf8   :  { %725 = vmatprep.subr.mxu1 %v822_v1 }
  0xf9   :  { %726 = vmatpush3.msra.mxu1 %v334_v58 }
  0xfa   :  { %727 = vmatprep.subr.mxu1 %v822_v1 }
  0xfb   :  { %728 = vmatpush3.msra.mxu1 %v333_v59 }
  0xfc   :  { %729 = vmatprep.subr.mxu1 %v822_v1 }
  0xfd   :  { %730 = vmatpush3.msra.mxu1 %v332_v60 }
  0xfe   :  { %731 = vmatprep.subr.mxu1 %v822_v1 }
  0xff   :  { %732 = vmatpush3.msra.mxu1 %v331_v61 }
 0x100   :  { %733 = vmatprep.subr.mxu1 %v822_v1 }
 0x101   :  { %734 = vmatpush3.msra.mxu1 %v330_v4 }
 0x102   :  { %735 = vmatprep.subr.mxu1 %v822_v1 }
 0x103   :  { %736 = vmatpush3.msra.mxu1 %v329_v5 }
 0x104   :  { %737 = vmatprep.subr.mxu1 %v822_v1 }
 0x105   :  { %738 = vmatpush3.msra.mxu1 %v328_v6 }
 0x106   :  { %739 = vmatprep.subr.mxu1 %v822_v1 }
 0x107   :  { %740 = vmatpush3.msra.mxu1 %v327_v7 }
 0x108   :  { %741 = vmatprep.subr.mxu1 %v822_v1 }
 0x109   :  { %742 = vmatpush3.msra.mxu1 %v326_v8 }
 0x10a   :  { %743 = vmatprep.subr.mxu1 %v822_v1 }
 0x10b   :  { %744 = vmatpush3.msra.mxu1 %v325_v9 }
 0x10c   :  { %745 = vmatprep.subr.mxu1 %v822_v1 }
 0x10d   :  { %746 = vmatpush3.msra.mxu1 %v324_v10 }
 0x10e   :  { %747 = vmatprep.subr.mxu1 %v822_v1 }
 0x10f   :  { %748 = vmatpush3.msra.mxu1 %v323_v11 }
 0x110   :  { %749 = vmatprep.subr.mxu1 %v822_v1 }
 0x111   :  { %750 = vmatpush3.msra.mxu1 %v322_v12 }
 0x1b2   :  { %v223_v63 = vpop.f32.mrf.mxu1 }
 0x1b3   :  { %v224_v0 = vadd.f32 %v525_v62, %v223_v63 }
 0x1b4   :  { %v683_v2 = vpop.f32.mrf.mxu1 }
 0x1b5   :  { %794 = vtanh.f32 %v224_v0 }
 0x1c2   :  { %v795_v3 = vpop.eup %794 }
 0x1c3   :  { %717 = vmatmul.mubr.f32.vlgmr.msra.gmra.mxu0 %v795_v3 }
 0x1c4   :  { %786 = vmatprep.mubr.msk.f32.mxu0 %vm823_vm0, %v822_v1  ;;  %755 = vmatpush3.msra.mxu0 %v431_v13 }
 0x1c5   :  { %756 = vmatprep.subr.mxu0 %v822_v1 }
 0x1c6   :  { %757 = vmatpush3.msra.mxu0 %v430_v14 }
 0x1c7   :  { %758 = vmatprep.subr.mxu0 %v822_v1 }
 0x1c8   :  { %759 = vmatpush3.msra.mxu0 %v429_v15 }
 0x1c9   :  { %760 = vmatprep.subr.mxu0 %v822_v1 }
 0x1ca   :  { %761 = vmatpush3.msra.mxu0 %v428_v16 }
 0x1cb   :  { %762 = vmatprep.subr.mxu0 %v822_v1 }
 0x1cc   :  { %763 = vmatpush3.msra.mxu0 %v427_v17 }
 0x1cd   :  { %764 = vmatprep.subr.mxu0 %v822_v1 }
 0x1ce   :  { %765 = vmatpush3.msra.mxu0 %v426_v18 }
 0x1cf   :  { %766 = vmatprep.subr.mxu0 %v822_v1 }
 0x1d0   :  { %767 = vmatpush3.msra.mxu0 %v425_v19 }
 0x1d1   :  { %768 = vmatprep.subr.mxu0 %v822_v1 }
 0x1d2   :  { %769 = vmatpush3.msra.mxu0 %v424_v25 }
 0x1d3   :  { %770 = vmatprep.subr.mxu0 %v822_v1 }
 0x1d4   :  { %771 = vmatpush3.msra.mxu0 %v423_v26 }
 0x1d5   :  { %772 = vmatprep.subr.mxu0 %v822_v1 }
 0x1d6   :  { %773 = vmatpush3.msra.mxu0 %v422_v27 }
 0x1d7   :  { %774 = vmatprep.subr.mxu0 %v822_v1 }
 0x1d8   :  { %775 = vmatpush3.msra.mxu0 %v421_v28 }
 0x1d9   :  { %776 = vmatprep.subr.mxu0 %v822_v1 }
 0x1da   :  { %777 = vmatpush3.msra.mxu0 %v420_v29 }
 0x1db   :  { %778 = vmatprep.subr.mxu0 %v822_v1 }
 0x1dc   :  { %779 = vmatpush3.msra.mxu0 %v419_v30 }
 0x1dd   :  { %780 = vmatprep.subr.mxu0 %v822_v1 }
 0x1de   :  { %781 = vmatpush3.msra.mxu0 %v418_v31 }
 0x1df   :  { %782 = vmatprep.subr.mxu0 %v822_v1 }
 0x1e0   :  { %783 = vmatpush3.msra.mxu0 %v417_v32 }
 0x1e1   :  { %784 = vmatprep.subr.mxu0 %v822_v1 }
 0x1e2   :  { %785 = vmatpush3.msra.mxu0 %v416_v33 }
 0x283   :  { %v317_v21 = vpop.f32.mrf.mxu0 }
 0x284   :  { %v318_v22 = vadd.f32 %v526_v20, %v317_v21 }
 0x285   :  { %v718_v23 = vpop.f32.mrf.mxu0 }
 0x286   :  { %796 = vtanh.f32 %v318_v22 }
 0x293   :  { %v797_v24 = vpop.eup %796 }
 0x294   :  { %752 = vmatmul.mubr.f32.vlgmr.msra.gmra.mxu1 %v797_v24 }
 0x354   :  { %v411_v35 = vpop.f32.mrf.mxu1 }
 0x355   :  { %v412_v36 = vadd.f32 %v527_v34, %v411_v35 }
 0x356   :  { %v753_v37 = vpop.f32.mrf.mxu1 }
 0x357   :  { %798 = vtanh.f32 %v412_v36 }
 0x364   :  { %v799_v38 = vpop.eup %798 }
 0x365   :  { %787 = vmatmul.mubr.f32.vlgmr.msra.gmra.mxu0 %v799_v38 }
 0x425   :  { %v505_v40 = vpop.f32.mrf.mxu0 }
 0x426   :  { %v506_v41 = vadd.f32 %v528_v39, %v505_v40 }
 0x427   :  { %v788_v1 = vpop.f32.mrf.mxu0 }
 0x428   :  { %509 = vst [vmem:[#allocation2] sm:$0xff] %v506_v41 }
 0x429   :  { %811 = shalt.err (!%p808_p4)
}
 0x42a   :  { %519 = dma.vmem_to_hbm [thread:$0]  %s517_s9, 128, %s1247_s11, [#allocation3]  }
 0x42b   :  { %820 = dma.done.wait [#allocation3], 128  }
 0x42c   :  { %821 = vsyncadd [#allocation3], 4294967168 }
 0x42d   :  { %523 = vsyncpa [#allocation3], 1 }

</bundles_post_ra>
